<compile_context>
chip_gen: v6e
topology: v6e:2x2x1
jax: 0.10.0
libtpu: 0.0.40
codegen_flags: <defaults>
</compile_context>

<pallas_src>
import functools

import jax
import jax.numpy as jnp
from jax.experimental import pallas as pl
from jax.experimental.pallas import tpu as pltpu

_INV_SQRT2 = 0.7071067811865475


def _round_up(x, m):
    return (x + m - 1) // m * m


def _erf_f32(x):
    # XLA-style float32 rational approximation of erf, written with mul/add plus a
    # single reciprocal so it always lowers in Mosaic.  The divide is performed on
    # the EUP (approx reciprocal) which has its own bundle slot -> ~free.
    alpha = (0.00022905065861350646, 0.0034082910107109506, 0.050955695062380861,
             0.18520832239976145, 1.128379143519084)
    beta = (-1.1791602954361697e-7, 2.3547966471313185e-5, 0.0010179625278914885,
            0.014070470171167667, 0.11098505178285362, 0.49746925110067538, 1.0)
    x = jnp.clip(x, -4.0, 4.0)
    x2 = x * x
    p = alpha[0]
    for c in alpha[1:]:
        p = p * x2 + c
    q = beta[0]
    for c in beta[1:]:
        q = q * x2 + c
    return (x * p) * pl.reciprocal(q, approx=True)


def _gelu_exact(x):
    # nn.GELU() default (approximate='none'): 0.5*x*(1+erf(x/sqrt(2)))
    return 0.5 * x * (1.0 + _erf_f32(x * _INV_SQRT2))


# ---------------------------- pass 1 kernel -----------------------------------
def _conv_gelu_stats_kernel(xt_ref, wf_ref, b_ref, y_ref, s1_ref, s2_ref,
                            *, L, L_tile, mask_lanes):
    t = pl.program_id(1)

    # One fused MXU matmul covers all K taps: (C_out_p, K*C_in_p) @ (K*C_in_p, Lt).
    acc = jnp.dot(wf_ref[...], xt_ref[0], preferred_element_type=jnp.float32)
    y = _gelu_exact(acc + b_ref[...])

    if mask_lanes:
        # Zero the lane-padding so it cannot pollute the batch statistics.
        lane = jax.lax.broadcasted_iota(jnp.int32, y.shape, 1) + t * L_tile
        y = jnp.where(lane < L, y, 0.0)

    y_ref[0] = y.astype(y_ref.dtype)

    # Streaming BatchNorm statistics: the stats blocks are revisited across the
    # L-tile axis (accumulator pattern with init on the first tile).
    @pl.when(t == 0)
    def _():
        s1_ref[...] = jnp.zeros_like(s1_ref)
        s2_ref[...] = jnp.zeros_like(s2_ref)

    s1_ref[0] += jnp.sum(y, axis=1, keepdims=True)
    s2_ref[0] += jnp.sum(y * y, axis=1, keepdims=True)


# ---------------------------- pass 2 kernel -----------------------------------
def _bn_residual_kernel(y_ref, x_ref, wr_ref, br_ref, scale_ref, shift_ref, o_ref):
    res = jnp.dot(wr_ref[...], x_ref[0], preferred_element_type=jnp.float32)
    res = res + br_ref[...]
    o_ref[0] = (res + y_ref[0] * scale_ref[...] + shift_ref[...]).astype(o_ref.dtype)


# ------------------------------- wrapper --------------------------------------
def resunit_forward(x, params, *, k=8, dilation=1, eps=1e-5, l_tile=512):
    """Pallas implementation of ResUnit.forward. x: (B, C_in, L) float32."""
    B, C_in, L = x.shape
    w, b, wr, br, gamma, beta = (params["w"], params["b"], params["wr"],
                                 params["br"], params["gamma"], params["beta"])
    C_out = w.shape[0]
    match_residual = (C_in > 1) and (C_in != C_out)

    f32 = jnp.float32
    x = x.astype(f32)

    # Hardware-friendly padded sizes.
    C_in_p = _round_up(C_in, 8)                     # f32 sublane multiple
    C_out_p = _round_up(C_out, 8)
    l_tile = max(128, _round_up(l_tile, 128))
    L_tile = min(l_tile, _round_up(L, 128))         # lane-dense, 128-aligned tiles
    L_pad = _round_up(L, L_tile)
    T = L_pad // L_tile
    KC = k * C_in_p

    # PyTorch Conv1d padding='same' (stride=1): left = total // 2.
    total_pad = dilation * (k - 1)
    left = total_pad // 2

    # Channel-pad x once; derive the tap-stacked conv input and the residual input.
    x_cp = jnp.pad(x, ((0, 0), (0, C_in_p - C_in), (0, 0)))
    x_halo = jnp.pad(
        x_cp, ((0, 0), (0, 0), (left, (total_pad - left) + (L_pad - L))))
    x_taps = jnp.concatenate(
        [x_halo[:, :, j * dilation: j * dilation + L_pad] for j in range(k)],
        axis=1)                                      # (B, K*C_in_p, L_pad)
    x_res = jnp.pad(x_cp, ((0, 0), (0, 0), (0, L_pad - L)))

    # Fused conv weight: w_fused[:, j*C_in_p + c] = w[:, c, j].
    w_p = jnp.pad(w.astype(f32),
                  ((0, C_out_p - C_out), (0, C_in_p - C_in), (0, 0)))
    w_fused = jnp.transpose(w_p, (0, 2, 1)).reshape(C_out_p, KC)
    b_p = jnp.pad(b.astype(f32), (0, C_out_p - C_out)).reshape(C_out_p, 1)

    # Residual branch folded into a single matmul (identity / channel-broadcast
    # expressed as an effective 1x1 weight so pass 2 has one code path).
    if match_residual:
        wr_eff = jnp.pad(wr.astype(f32),
                         ((0, C_out_p - C_out), (0, C_in_p - C_in)))
        br_eff = jnp.pad(br.astype(f32), (0, C_out_p - C_out)).reshape(C_out_p, 1)
    elif C_in == 1:
        wr_eff = jnp.zeros((C_out_p, C_in_p), f32).at[:, 0].set(1.0)
        br_eff = jnp.zeros((C_out_p, 1), f32)
    else:  # C_in == C_out: identity residual
        wr_eff = jnp.eye(C_out_p, C_in_p, dtype=f32)
        br_eff = jnp.zeros((C_out_p, 1), f32)

    vmem_limit = 32 * 1024 * 1024   # leaves headroom even on v7x (64 MiB physical)

    # ---- pass 1: conv + bias + GELU, streaming BN statistics --------------------
    kernel1 = functools.partial(_conv_gelu_stats_kernel, L=L, L_tile=L_tile,
                                mask_lanes=(L_pad > L))
    y, s1, s2 = pl.pallas_call(
        kernel1,
        grid=(B, T),
        in_specs=[
            pl.BlockSpec((1, KC, L_tile), lambda bi, ti: (bi, 0, ti)),
            pl.BlockSpec((C_out_p, KC), lambda bi, ti: (0, 0)),
            pl.BlockSpec((C_out_p, 1), lambda bi, ti: (0, 0)),
        ],
        out_specs=[
            pl.BlockSpec((1, C_out_p, L_tile), lambda bi, ti: (bi, 0, ti)),
            pl.BlockSpec((1, C_out_p, 1), lambda bi, ti: (bi, 0, 0)),
            pl.BlockSpec((1, C_out_p, 1), lambda bi, ti: (bi, 0, 0)),
        ],
        out_shape=[
            jax.ShapeDtypeStruct((B, C_out_p, L_pad), f32),
            jax.ShapeDtypeStruct((B, C_out_p, 1), f32),
            jax.ShapeDtypeStruct((B, C_out_p, 1), f32),
        ],
        compiler_params=pltpu.CompilerParams(
            dimension_semantics=("parallel", "arbitrary"),
            vmem_limit_bytes=vmem_limit),
    )(x_taps, w_fused, b_p)

    # ---- BatchNorm1d batch statistics (training mode, biased variance) ----------
    # TODO(synk): running_mean / running_var train-mode side effects are not
    # reproduced; only the forward output is.
    n = float(B * L)
    mean = jnp.sum(s1[:, :, 0], axis=0) / n                     # (C_out_p,)
    ex2 = jnp.sum(s2[:, :, 0], axis=0) / n
    var = jnp.maximum(ex2 - mean * mean, 0.0)
    inv_std = jax.lax.rsqrt(var + eps)
    gamma_p = jnp.pad(gamma.astype(f32), (0, C_out_p - C_out))
    beta_p = jnp.pad(beta.astype(f32), (0, C_out_p - C_out))
    scale = (gamma_p * inv_std).reshape(C_out_p, 1)
    shift = (beta_p - mean * gamma_p * inv_std).reshape(C_out_p, 1)

    # ---- pass 2: normalize + residual matmul + add (fully parallel) -------------
    out_p = pl.pallas_call(
        _bn_residual_kernel,
        grid=(B, T),
        in_specs=[
            pl.BlockSpec((1, C_out_p, L_tile), lambda bi, ti: (bi, 0, ti)),
            pl.BlockSpec((1, C_in_p, L_tile), lambda bi, ti: (bi, 0, ti)),
            pl.BlockSpec((C_out_p, C_in_p), lambda bi, ti: (0, 0)),
            pl.BlockSpec((C_out_p, 1), lambda bi, ti: (0, 0)),
            pl.BlockSpec((C_out_p, 1), lambda bi, ti: (0, 0)),
            pl.BlockSpec((C_out_p, 1), lambda bi, ti: (0, 0)),
        ],
        out_specs=pl.BlockSpec((1, C_out_p, L_tile), lambda bi, ti: (bi, 0, ti)),
        out_shape=jax.ShapeDtypeStruct((B, C_out_p, L_pad), f32),
        compiler_params=pltpu.CompilerParams(
            dimension_semantics=("parallel", "parallel"),
            vmem_limit_bytes=vmem_limit),
    )(y, x_res, wr_eff, br_eff, scale, shift)

    return out_p[:, :C_out, :L]


# ------------------------------ reference -------------------------------------
def resunit_reference(x, params, *, k=8, dilation=1, eps=1e-5):
    """Pure-JAX reference mirroring the PyTorch module (train-mode BatchNorm)."""
    w, b, wr, br, gamma, beta = (params["w"], params["b"], params["wr"],
                                 params["br"], params["gamma"], params["beta"])
    B, C_in, L = x.shape
    C_out = w.shape[0]
    total_pad = dilation * (k - 1)
    left = total_pad // 2
    xpad = jnp.pad(x, ((0, 0), (0, 0), (left, total_pad - left)))
    y = jax.lax.conv_general_dilated(
        xpad, w, window_strides=(1,), padding="VALID", rhs_dilation=(dilation,),
        dimension_numbers=("NCH", "OIH", "NCH"))
    y = y + b[None, :, None]
    y = jax.nn.gelu(y, approximate=False)
    mean = jnp.mean(y, axis=(0, 2), keepdims=True)
    var = jnp.mean((y - mean) ** 2, axis=(0, 2), keepdims=True)
    y = (y - mean) * jax.lax.rsqrt(var + eps) * gamma[None, :, None] + beta[None, :, None]
    if (C_in > 1) and (C_in != C_out):
        res = jax.lax.conv_general_dilated(
            x, wr[:, :, None], window_strides=(1,), padding="VALID",
            dimension_numbers=("NCH", "OIH", "NCH")) + br[None, :, None]
    else:
        res = x
    return res + y


if __name__ == "__main__":
    B, C_in, C_out, L, K = 2, 4, 8, 16, 8
    key = jax.random.PRNGKey(0)
    kx, kw, kb, kwr, kbr, kg, kbt = jax.random.split(key, 7)
    x = jax.random.normal(kx, (B, C_in, L), jnp.float32)
    params = {
        "w": jax.random.normal(kw, (C_out, C_in, K), jnp.float32) / jnp.sqrt(C_in * K),
        "b": 0.1 * jax.random.normal(kb, (C_out,), jnp.float32),
        "wr": jax.random.normal(kwr, (C_out, C_in), jnp.float32) / jnp.sqrt(C_in),
        "br": 0.1 * jax.random.normal(kbr, (C_out,), jnp.float32),
        "gamma": 1.0 + 0.1 * jax.random.normal(kg, (C_out,), jnp.float32),
        "beta": 0.1 * jax.random.normal(kbt, (C_out,), jnp.float32),
    }

    out = jax.block_until_ready(resunit_forward(x, params, k=K, dilation=1))
    ref = jax.block_until_ready(resunit_reference(x, params, k=K, dilation=1))

    assert out.shape == (B, C_out, L) and out.dtype == jnp.float32
    # Tolerance covers default-precision (bf16-operand / f32-accumulate) MXU
    # matmuls and the EUP approximate reciprocal inside the erf approximation.
    max_err = float(jnp.max(jnp.abs(out - ref)))
    assert max_err < 3e-2, f"kernel/reference mismatch, max abs err = {max_err}"
    print("KERNEL_OK")
</pallas_src>

<mosaic_0001>
module attributes {stable_mosaic.version = 11 : i64} {
  func.func @_conv_gelu_stats_kernel(%arg0: i32, %arg1: i32, %arg2: memref<1x64x128xf32, #tpu.memory_space<vmem>>, %arg3: memref<8x64xf32, #tpu.memory_space<vmem>>, %arg4: memref<8x1xf32, #tpu.memory_space<vmem>>, %arg5: memref<1x8x128xf32, #tpu.memory_space<vmem>>, %arg6: memref<1x8x1xf32, #tpu.memory_space<vmem>>, %arg7: memref<1x8x1xf32, #tpu.memory_space<vmem>>) attributes {dimension_semantics = [#tpu.dimension_semantics<parallel>, #tpu.dimension_semantics<arbitrary>], iteration_bounds = array<i64: 2, 1>, scalar_prefetch = 0 : i64, scratch_operands = 0 : i64, tpu.core_type = #tpu.core_type<tc>, window_params = [{transform_indices = @transform_0, window_bounds = array<i64: 1, 64, 128>}, {pipeline_mode = #tpu.pipeline_mode<synchronous>, transform_indices = @transform_1, window_bounds = array<i64: 8, 64>}, {pipeline_mode = #tpu.pipeline_mode<synchronous>, transform_indices = @transform_2, window_bounds = array<i64: 8, 1>}, {transform_indices = @transform_3, window_bounds = array<i64: 1, 8, 128>}, {transform_indices = @transform_4, window_bounds = array<i64: 1, 8, 1>}, {transform_indices = @transform_5, window_bounds = array<i64: 1, 8, 1>}]} {
    %c0 = arith.constant 0 : index
    %c0_0 = arith.constant 0 : index
    %0 = vector.load %arg3[%c0, %c0_0] : memref<8x64xf32, #tpu.memory_space<vmem>>, vector<8x64xf32>
    %c0_1 = arith.constant 0 : index
    %c0_2 = arith.constant 0 : index
    %c0_3 = arith.constant 0 : index
    %1 = vector.load %arg2[%c0_1, %c0_2, %c0_3] : memref<1x64x128xf32, #tpu.memory_space<vmem>>, vector<1x64x128xf32>
    %2 = vector.shape_cast %1 : vector<1x64x128xf32> to vector<64x128xf32>
    %cst = arith.constant dense<0.000000e+00> : vector<8x128xf32>
    %3 = tpu.matmul %0, %2, %cst {dimension_numbers = #tpu.dot_dimension_numbers<[1], [0], [0], [1], [0, 0, 1, 1], [], []>} : vector<8x64xf32>, vector<64x128xf32>, vector<8x128xf32> -> vector<8x128xf32>
    %c0_4 = arith.constant 0 : index
    %c0_5 = arith.constant 0 : index
    %4 = vector.load %arg4[%c0_4, %c0_5] : memref<8x1xf32, #tpu.memory_space<vmem>>, vector<8x1xf32>
    %5 = vector.broadcast %4 : vector<8x1xf32> to vector<8x128xf32>
    %6 = arith.addf %3, %5 : vector<8x128xf32>
    %cst_6 = arith.constant 5.000000e-01 : f32
    %7 = vector.broadcast %cst_6 : f32 to vector<8x128xf32>
    %8 = arith.mulf %7, %6 : vector<8x128xf32>
    %cst_7 = arith.constant 0.707106769 : f32
    %9 = vector.broadcast %cst_7 : f32 to vector<8x128xf32>
    %10 = arith.mulf %6, %9 : vector<8x128xf32>
    %cst_8 = arith.constant -4.000000e+00 : f32
    %cst_9 = arith.constant 4.000000e+00 : f32
    %11 = vector.broadcast %cst_8 : f32 to vector<8x128xf32>
    %12 = arith.maximumf %11, %10 : vector<8x128xf32>
    %13 = vector.broadcast %cst_9 : f32 to vector<8x128xf32>
    %14 = arith.minimumf %13, %12 : vector<8x128xf32>
    %15 = arith.mulf %14, %14 : vector<8x128xf32>
    %cst_10 = arith.constant 2.29050653E-4 : f32
    %16 = vector.broadcast %cst_10 : f32 to vector<8x128xf32>
    %17 = arith.mulf %16, %15 : vector<8x128xf32>
    %cst_11 = arith.constant 0.00340829091 : f32
    %18 = vector.broadcast %cst_11 : f32 to vector<8x128xf32>
    %19 = arith.addf %17, %18 : vector<8x128xf32>
    %20 = arith.mulf %19, %15 : vector<8x128xf32>
    %cst_12 = arith.constant 0.0509556942 : f32
    %21 = vector.broadcast %cst_12 : f32 to vector<8x128xf32>
    %22 = arith.addf %20, %21 : vector<8x128xf32>
    %23 = arith.mulf %22, %15 : vector<8x128xf32>
    %cst_13 = arith.constant 0.185208321 : f32
    %24 = vector.broadcast %cst_13 : f32 to vector<8x128xf32>
    %25 = arith.addf %23, %24 : vector<8x128xf32>
    %26 = arith.mulf %25, %15 : vector<8x128xf32>
    %cst_14 = arith.constant 1.12837911 : f32
    %27 = vector.broadcast %cst_14 : f32 to vector<8x128xf32>
    %28 = arith.addf %26, %27 : vector<8x128xf32>
    %cst_15 = arith.constant -1.17916031E-7 : f32
    %29 = vector.broadcast %cst_15 : f32 to vector<8x128xf32>
    %30 = arith.mulf %29, %15 : vector<8x128xf32>
    %cst_16 = arith.constant 2.35479656E-5 : f32
    %31 = vector.broadcast %cst_16 : f32 to vector<8x128xf32>
    %32 = arith.addf %30, %31 : vector<8x128xf32>
    %33 = arith.mulf %32, %15 : vector<8x128xf32>
    %cst_17 = arith.constant 0.00101796258 : f32
    %34 = vector.broadcast %cst_17 : f32 to vector<8x128xf32>
    %35 = arith.addf %33, %34 : vector<8x128xf32>
    %36 = arith.mulf %35, %15 : vector<8x128xf32>
    %cst_18 = arith.constant 0.0140704699 : f32
    %37 = vector.broadcast %cst_18 : f32 to vector<8x128xf32>
    %38 = arith.addf %36, %37 : vector<8x128xf32>
    %39 = arith.mulf %38, %15 : vector<8x128xf32>
    %cst_19 = arith.constant 0.110985048 : f32
    %40 = vector.broadcast %cst_19 : f32 to vector<8x128xf32>
    %41 = arith.addf %39, %40 : vector<8x128xf32>
    %42 = arith.mulf %41, %15 : vector<8x128xf32>
    %cst_20 = arith.constant 0.497469246 : f32
    %43 = vector.broadcast %cst_20 : f32 to vector<8x128xf32>
    %44 = arith.addf %42, %43 : vector<8x128xf32>
    %45 = arith.mulf %44, %15 : vector<8x128xf32>
    %cst_21 = arith.constant 1.000000e+00 : f32
    %46 = vector.broadcast %cst_21 : f32 to vector<8x128xf32>
    %47 = arith.addf %45, %46 : vector<8x128xf32>
    %48 = arith.mulf %14, %28 : vector<8x128xf32>
    %49 = tpu.reciprocal %47 {approx = true} : vector<8x128xf32> -> vector<8x128xf32>
    %50 = arith.mulf %48, %49 : vector<8x128xf32>
    %cst_22 = arith.constant 1.000000e+00 : f32
    %51 = vector.broadcast %cst_22 : f32 to vector<8x128xf32>
    %52 = arith.addf %51, %50 : vector<8x128xf32>
    %53 = arith.mulf %8, %52 : vector<8x128xf32>
    %54 = tpu.iota {dimensions = array<i32: 1>} : vector<8x128xi32>
    %c128_i32 = arith.constant 128 : i32
    %55 = arith.muli %arg1, %c128_i32 : i32
    %56 = vector.broadcast %55 : i32 to vector<8x128xi32>
    %57 = arith.addi %54, %56 : vector<8x128xi32>
    %c16_i32 = arith.constant 16 : i32
    %58 = vector.broadcast %c16_i32 : i32 to vector<8x128xi32>
    %59 = arith.cmpi slt, %57, %58 : vector<8x128xi32>
    %cst_23 = arith.constant 0.000000e+00 : f32
    %60 = vector.broadcast %cst_23 : f32 to vector<8x128xf32>
    %61 = arith.select %59, %53, %60 : vector<8x128xi1>, vector<8x128xf32>
    %c0_24 = arith.constant 0 : index
    %c0_25 = arith.constant 0 : index
    %c0_26 = arith.constant 0 : index
    %62 = vector.load %arg5[%c0_24, %c0_25, %c0_26] : memref<1x8x128xf32, #tpu.memory_space<vmem>>, vector<1x8x128xf32>
    %63 = vector.shape_cast %62 : vector<1x8x128xf32> to vector<8x128xf32>
    %64 = vector.shape_cast %61 : vector<8x128xf32> to vector<1x8x128xf32>
    tpu.vector_store %arg5[%c0_24, %c0_25, %c0_26], %64 {strides = array<i32>} : memref<1x8x128xf32, #tpu.memory_space<vmem>>, vector<1x8x128xf32>,
    %c0_i32 = arith.constant 0 : i32
    %65 = arith.cmpi eq, %arg1, %c0_i32 : i32
    %66 = arith.extui %65 : i1 to i32
    %c0_i32_27 = arith.constant 0 : i32
    %67 = arith.cmpi ne, %66, %c0_i32_27 : i32
    scf.if %67 {
      %cst_42 = arith.constant 0.000000e+00 : f32
      %85 = vector.broadcast %cst_42 : f32 to vector<1x8x1xf32>
      %c0_43 = arith.constant 0 : index
      %c0_44 = arith.constant 0 : index
      %c0_45 = arith.constant 0 : index
      %86 = vector.load %arg6[%c0_43, %c0_44, %c0_45] : memref<1x8x1xf32, #tpu.memory_space<vmem>>, vector<1x8x1xf32>
      tpu.vector_store %arg6[%c0_43, %c0_44, %c0_45], %85 {strides = array<i32>} : memref<1x8x1xf32, #tpu.memory_space<vmem>>, vector<1x8x1xf32>,
      %cst_46 = arith.constant 0.000000e+00 : f32
      %87 = vector.broadcast %cst_46 : f32 to vector<1x8x1xf32>
      %c0_47 = arith.constant 0 : index
      %c0_48 = arith.constant 0 : index
      %c0_49 = arith.constant 0 : index
      %88 = vector.load %arg7[%c0_47, %c0_48, %c0_49] : memref<1x8x1xf32, #tpu.memory_space<vmem>>, vector<1x8x1xf32>
      tpu.vector_store %arg7[%c0_47, %c0_48, %c0_49], %87 {strides = array<i32>} : memref<1x8x1xf32, #tpu.memory_space<vmem>>, vector<1x8x1xf32>,
    } else {
    }
    %c0_28 = arith.constant 0 : index
    %c0_29 = arith.constant 0 : index
    %c0_30 = arith.constant 0 : index
    %68 = vector.load %arg6[%c0_28, %c0_29, %c0_30] : memref<1x8x1xf32, #tpu.memory_space<vmem>>, vector<1x8x1xf32>
    %69 = vector.shape_cast %68 : vector<1x8x1xf32> to vector<8x1xf32>
    %cst_31 = arith.constant dense<0.000000e+00> : vector<8xf32>
    %70 = vector.multi_reduction <add>, %61, %cst_31 [1] : vector<8x128xf32> to vector<8xf32>
    %71 = vector.shape_cast %70 : vector<8xf32> to vector<8x1xf32>
    %72 = arith.addf %69, %71 : vector<8x1xf32>
    %c0_32 = arith.constant 0 : index
    %c0_33 = arith.constant 0 : index
    %c0_34 = arith.constant 0 : index
    %73 = vector.load %arg6[%c0_32, %c0_33, %c0_34] : memref<1x8x1xf32, #tpu.memory_space<vmem>>, vector<1x8x1xf32>
    %74 = vector.shape_cast %73 : vector<1x8x1xf32> to vector<8x1xf32>
    %75 = vector.shape_cast %72 : vector<8x1xf32> to vector<1x8x1xf32>
    tpu.vector_store %arg6[%c0_32, %c0_33, %c0_34], %75 {strides = array<i32>} : memref<1x8x1xf32, #tpu.memory_space<vmem>>, vector<1x8x1xf32>,
    %c0_35 = arith.constant 0 : index
    %c0_36 = arith.constant 0 : index
    %c0_37 = arith.constant 0 : index
    %76 = vector.load %arg7[%c0_35, %c0_36, %c0_37] : memref<1x8x1xf32, #tpu.memory_space<vmem>>, vector<1x8x1xf32>
    %77 = vector.shape_cast %76 : vector<1x8x1xf32> to vector<8x1xf32>
    %78 = arith.mulf %61, %61 : vector<8x128xf32>
    %cst_38 = arith.constant dense<0.000000e+00> : vector<8xf32>
    %79 = vector.multi_reduction <add>, %78, %cst_38 [1] : vector<8x128xf32> to vector<8xf32>
    %80 = vector.shape_cast %79 : vector<8xf32> to vector<8x1xf32>
    %81 = arith.addf %77, %80 : vector<8x1xf32>
    %c0_39 = arith.constant 0 : index
    %c0_40 = arith.constant 0 : index
    %c0_41 = arith.constant 0 : index
    %82 = vector.load %arg7[%c0_39, %c0_40, %c0_41] : memref<1x8x1xf32, #tpu.memory_space<vmem>>, vector<1x8x1xf32>
    %83 = vector.shape_cast %82 : vector<1x8x1xf32> to vector<8x1xf32>
    %84 = vector.shape_cast %81 : vector<8x1xf32> to vector<1x8x1xf32>
    tpu.vector_store %arg7[%c0_39, %c0_40, %c0_41], %84 {strides = array<i32>} : memref<1x8x1xf32, #tpu.memory_space<vmem>>, vector<1x8x1xf32>,
    return
  }
  func.func @transform_0(%arg0: i32, %arg1: i32) -> (i32, i32, i32) {
    %c0_i32 = arith.constant 0 : i32
    %c0_i32_0 = arith.constant 0 : i32
    return %arg0, %c0_i32, %arg1 : i32, i32, i32
  }
  func.func @transform_1(%arg0: i32, %arg1: i32) -> (i32, i32) {
    %c0_i32 = arith.constant 0 : i32
    %c0_i32_0 = arith.constant 0 : i32
    %c0_i32_1 = arith.constant 0 : i32
    return %c0_i32, %c0_i32_0 : i32, i32
  }
  func.func @transform_2(%arg0: i32, %arg1: i32) -> (i32, i32) {
    %c0_i32 = arith.constant 0 : i32
    %c0_i32_0 = arith.constant 0 : i32
    %c0_i32_1 = arith.constant 0 : i32
    return %c0_i32, %c0_i32_0 : i32, i32
  }
  func.func @transform_3(%arg0: i32, %arg1: i32) -> (i32, i32, i32) {
    %c0_i32 = arith.constant 0 : i32
    %c0_i32_0 = arith.constant 0 : i32
    return %arg0, %c0_i32, %arg1 : i32, i32, i32
  }
  func.func @transform_4(%arg0: i32, %arg1: i32) -> (i32, i32, i32) {
    %c0_i32 = arith.constant 0 : i32
    %c0_i32_0 = arith.constant 0 : i32
    %c0_i32_1 = arith.constant 0 : i32
    return %arg0, %c0_i32, %c0_i32_0 : i32, i32, i32
  }
  func.func @transform_5(%arg0: i32, %arg1: i32) -> (i32, i32, i32) {
    %c0_i32 = arith.constant 0 : i32
    %c0_i32_0 = arith.constant 0 : i32
    %c0_i32_1 = arith.constant 0 : i32
    return %arg0, %c0_i32, %c0_i32_0 : i32, i32, i32
  }
}

</mosaic_0001>

<bundles_post_ra>
// kernel: tpu_custom_call.1
= control target key start
LH: loop header
LB: loop body
LE: loop exit
PB: predicated region body
PF: predicated region fallthrough
CT: control target
= control target key end

     0   :  { %11 = vsyncpa [#allocation3], 0  ;;  %s1028_s0 = inlined_call_operand.hbm [shape: f32[2,64,128], index: 0, kind: input, shape index: {}]   ;;  %s1029_s1 = inlined_call_operand.vmem [shape: f32[8,64], index: 1, kind: input, shape index: {}]   ;;  %s1030_s2 = inlined_call_operand.vmem [shape: f32[8,1], index: 2, kind: input, shape index: {}]   ;;  %s1031_s3 = inlined_call_operand.hbm [shape: f32[2,8,128], index: 3, kind: output, shape index: {0}]   ;;  %s1032_s4 = inlined_call_operand.vmem [shape: f32[2,8,1], index: 4, kind: output, shape index: {1}]   ;;  %s1033_s5 = inlined_call_operand.vmem [shape: f32[2,8,1], index: 5, kind: output, shape index: {2}]  }
   0x1   :  { %13 = vsyncpa [#allocation3 + $0x1], 0 }
   0x2   :  { %14 = vsyncpa [#allocation4], 0 }
   0x3   :  { %16 = vsyncpa [#allocation4 + $0x1], 0  ;;  %s849_s18 = smov 0   ;;  %s851_s19 = smov 0  }
   0x4   :  { %s853_s20 = smov 0   ;;  %s855_s21 = smov 0  }
   0x5   :  { %s857_s22 = smov 0   ;;  %s859_s23 = smov 0  }
   0x6 LB: > { %s585_s24 = sadd.s32 4294967295, %s810_s23   ;;  %s586_s25 = sadd.s32 4294967294, %s810_s23   ;;  %s810_s23 = sphi %s859_s23, %s22_s23   ;;  %s806_s22 = sphi %s857_s22, %s1044_s22   ;;  %s802_s21 = sphi %s855_s21, %s1043_s21   ;;  %s798_s20 = sphi %s853_s20, %s1042_s20   ;;  %s794_s19 = sphi %s851_s19, %s1041_s19   ;;  %s790_s18 = sphi %s849_s18, %s1040_s18  }
   0x7   : > { %s34_s26 = sadd.s32 1, %s806_s22  ;;  %s43_s27 = sadd.s32 1, %s798_s20 }
   0x8   : > { %p36_p0 = scmp.ge.s32.totalorder %s34_s26, 2  ;;  %p50_p1 = scmp.ne.s32.totalorder %s798_s20, %s794_s19 }
   0x9   : > { %p51_p2 = scmp.eq.s32.totalorder %s810_s23, 0  ;;  %p56_p3 = scmp.ne.s32.totalorder %s794_s19, %s790_s18 }
   0xa   : > { %s1046_s26 = smov (%p36_p0, %s34_s26), 0  ;;  %p57_p5 = scmp.eq.s32.totalorder %s585_s24, 0 }
   0xb   : > { %p890_p4 = por %p51_p2, %p50_p1  ;;  %s38_s29 = ssub.s32 %s806_s22, %s1046_s26 }
   0xc   : > { %p124_p6 = scmp.eq.s32.totalorder %s585_s24, 1  ;;  %p41_p7 = scmp.eq.s32.totalorder %s38_s29, 0 }
   0xd   : > { %p896_p8 = por %p57_p5, %p56_p3  ;;  %p130_p10 = scmp.eq.s32.totalorder %s586_s25, 1 }
   0xe   : > { %p900_p9 = por %p124_p6, %p50_p1  ;;  %p644_p13 = scmp.lt.s32.totalorder %s810_s23, 2 }
   0xf   : > { %s905_s7 = scalar_select %p41_p7, %s798_s20, %s43_s27  }
  0x10   : > { %p907_p11 = por %p130_p10, %p56_p3  ;;  %s208_s9 = sand.u32 1, %s798_s20  }
  0x11   : > { %s589_s10 = sshll.u32 %s208_s9, 6  ;;  %s603_s11 = sshll.u32 %s806_s22, 10 }
  0x12   : > { %s219_s14 = scalar_lea.hbm %s1028_s0, %s603_s11  ;;  %s212_s15 = scalar_lea.vmem [#allocation2], %s589_s10 }
  0x13   : > { %s220_s16 = sshll.u32 %s212_s15, 4  ;;  %p920_p0 = pnand %p644_p13, %p890_p4  ;;  %s221_s16 = int_to_ptr.vmem [resolvable:$true] %s220_s16 }
  0x14   : > { %p592_p1 = scmp.ge.s32.totalorder %s810_s23, 1  ;;  %s209_s24 = scalar_lea.sflag [#allocation3], %s208_s9 }
  0x15   : > { %p704_p2 = pneg %p920_p0  ;;  %s715_s25 = scalar_lea.vmem %s221_s16, 1024 }
  0x16   : > { %p716_p3 = scmp.ne.s32.totalorder %s221_s16, %s715_s25  ;;  %s812_s27 = smov [#allocation2]  }
  0x17   : > { %s720_s29 = sshll.u32 %s812_s27, 4  ;;  %s721_s29 = int_to_ptr.vmem [resolvable:$false] %s720_s29 }
  0x18   : > { %p718_p5 = pnand %p716_p3, %p704_p2  ;;  %s722_s10 = scalar_lea.vmem %s721_s29, 2048 }
  0x19   : > { %p723_p7 = scmp.lt.s32.totalorder %s221_s16, %s721_s29  ;;  %p724_p10 = scmp.lt.s32.totalorder %s722_s10, %s715_s25 }
  0x1a   : > { %p719_p6 = pneg %p718_p5 }
  0x1b   : > { %p725_p12 = por %p724_p10, %p723_p7 }
  0x1d   : > { %p726_p4 = pnand %p725_p12, %p719_p6 }
  0x1f   : > { %729 = shalt.err (!%p726_p4)
}
  0x20   : > { %s813_s28 = smov 128   ;;  %s814_s9 = smov 8  }
  0x21   : > { %639 = dma.hbm_to_vmem [thread:$0]  (!%p920_p0), %s219_s14, 1024, %s221_s16, %s209_s24, %s813_s28, %s813_s28, %s814_s9  }
  0x22   : > { %p228_p13 = scmp.lt.s32.totalorder %s810_s23, 3 }
  0x24   : > { %p229_p2 = pnand %p592_p1, %p228_p13 }
  0x25   : > { %s933_s11 = sand.u32 (!%p229_p2), 1, %s794_s19  }
  0x26   : > { %232 = sbr.rel (%p229_p2) target bundleno = 450 (0x1c2), region = 32  ;;  %s593_s12 = sshll.u32 (!%p229_p2), %s933_s11, 6 }
  0x27   : > { %s235_s13 = scalar_lea.sflag (!%p229_p2), [#allocation3], %s933_s11  ;;  %s238_s15 = scalar_lea.vmem (!%p229_p2), [#allocation2], %s593_s12 }
  0x2b   : > { %781 = dma.done.wait (%p896_p8), %s235_s13, 1024  }
  0x2c   : > { %783 = vsyncadd (%p896_p8), %s235_s13, 4294966272  ;;  %v815_v0 = vmov 0.0   ;;  %vm816_vm0 = vmmov 0   ;;  %v817_v1 = vmov 0   ;;  %v289_v2 = vld [vmem:[%s238_s15 + $0x38] sm:$0xff]  ;;  %v288_v3 = vld [vmem:[%s238_s15 + $0x30] sm:$0xff]  ;;  %v400_v39 = vlaneseq }
  0x2d   : > { %613 = vmatprep.subr.mxu0 %v815_v0  ;;  %629 = vmatprep.mubr.msk.f32.mxu0 %vm816_vm0, %v815_v0  ;;  %v287_v4 = vld [vmem:[%s238_s15 + $0x28] sm:$0xff]  ;;  %v290_v5 = vld [vmem:[%s1030_s2] sm:$0xff]  ;;  %v285_v7 = vld [vmem:[%s238_s15 + $0x18] sm:$0xff]  ;;  %vm296_vm1 = vcmask 523264   ;;  %p273_p8 = scmp.lt.s32.totalorder %s802_s21, 1  ;;  %vm412_vm2 = vcmask 7168  }
  0x2e   : > { %699 = vset.pattern.permute.xlu0 %v817_v1  ;;  %614 = vmatpush3.msra.mxu0 %v289_v2  ;;  %v286_v6 = vld [vmem:[%s238_s15 + $0x20] sm:$0xff]  ;;  %v284_v8 = vld [vmem:[%s238_s15 + $0x10] sm:$0xff]  ;;  %v283_v9 = vld [vmem:[%s238_s15 + $0x8] sm:$0xff]  ;;  %v401_v42 = vand.u32 127, %v400_v39  ;;  %s594_s28 = sshll.u32 %s933_s11, 3  ;;  %s600_s14 = sshll.u32 %s802_s21, 7 }
  0x2f   : > { %615 = vmatprep.subr.mxu0 %v815_v0  ;;  %293 = vperm.xlu0 %699, %v290_v5   ;;  %v282_v10 = vld [vmem:[%s238_s15] sm:$0xff]  ;;  %s958_s24 = scalar_select %p273_p8, %s802_s21, 1 }
  0x30   : > { %616 = vmatpush3.msra.mxu0 %v288_v3  ;;  %v281_v11 = vld [vmem:[%s1029_s1] sm:$0xff]  ;;  %vm405_vm3 = vcmp.lt.s32.totalorder %v401_v42, 16  ;;  %s260_s9 = scalar_lea.vmem [#allocation5], %s594_s28  ;;  %s448_s27 = scalar_lea.hbm %s1031_s3, %s600_s14 }
  0x31   : > { %617 = vmatprep.subr.mxu0 %v815_v0  ;;  %s595_s25 = sshll.u32 %s958_s24, 3  ;;  %s450_s16 = sshll.u32 %s260_s9, 4  ;;  %s451_s16 = int_to_ptr.vmem [resolvable:$true] %s450_s16 }
  0x32   : > { %618 = vmatpush3.msra.mxu0 %v287_v4  ;;  %s966_s10 = scalar_lea.vmem %s1032_s4, %s595_s25  ;;  %s977_s15 = scalar_lea.vmem %s1033_s5, %s595_s25 }
  0x33   : > { %619 = vmatprep.subr.mxu0 %v815_v0  ;;  %413 = vst.msk [vmem:[%s966_s10] sm:$0xff] %vm412_vm2, %v815_v0  ;;  %414 = vst.msk [vmem:[%s977_s15] sm:$0xff] %vm412_vm2, %v815_v0  ;;  %s428_s29 = scalar_lea.sflag [#allocation4], %s933_s11  ;;  %s730_s28 = scalar_lea.vmem %s451_s16, 128 }
  0x34   : > { %620 = vmatpush3.msra.mxu0 %v286_v6  ;;  %p731_p12 = scmp.ne.s32.totalorder %s451_s16, %s730_s28  ;;  %s818_s24 = smov [#allocation5]  }
  0x35   : > { %621 = vmatprep.subr.mxu0 %v815_v0  ;;  %s734_s25 = sshll.u32 %s818_s24, 4  ;;  %s735_s25 = int_to_ptr.vmem [resolvable:$false] %s734_s25 }
  0x36   : > { %622 = vmatpush3.msra.mxu0 %v285_v7  ;;  %p732_p0 = pnand %p731_p12, %p900_p9  ;;  %s736_s12 = scalar_lea.vmem %s735_s25, 256 }
  0x37   : > { %623 = vmatprep.subr.mxu0 %v815_v0  ;;  %p737_p3 = scmp.lt.s32.totalorder %s451_s16, %s735_s25  ;;  %p738_p5 = scmp.lt.s32.totalorder %s736_s12, %s730_s28 }
  0x38   : > { %624 = vmatpush3.msra.mxu0 %v284_v8  ;;  %p733_p1 = pneg %p732_p0 }
  0x39   : > { %625 = vmatprep.subr.mxu0 %v815_v0  ;;  %p739_p6 = por %p738_p5, %p737_p3 }
  0x3a   : > { %626 = vmatpush3.msra.mxu0 %v283_v9 }
  0x3b   : > { %627 = vmatprep.subr.mxu0 %v815_v0  ;;  %p740_p7 = pnand %p739_p6, %p733_p1 }
  0x3c   : > { %628 = vmatpush3.msra.mxu0 %v282_v10 }
  0x3d   : > { %630 = vmatmul.mubr.msk.f32.vlgmr.msra.gmra.mxu0 %vm296_vm1, %v281_v11 }
  0xaa   : > { %v294_v12 = vpop.permute.xlu0 %293 }
  0xfd   : > { %v366_v13 = vpop.f32.mrf.mxu0 }
  0xfe   : > { %v367_v14 = vadd.f32 %v366_v13, %v294_v12 }
  0xff   : > { %v631_v15 = vpop.f32.mrf.mxu0 }
 0x100   : > { %v371_v16 = vmul.f32 0.70710677, %v367_v14  ;;  %v370_v44 = vmul.f32 0.5, %v367_v14 }
 0x102   : > { %v598_v17 = vclamps-f32 %v371_v16, 4.0 }
 0x104   : > { %v374_v18 = vmul.f32 %v598_v17, %v598_v17 }
 0x106   : > { %v383_v19 = vmul.f32 -1.1791603e-07, %v374_v18  ;;  %v375_v21 = vmul.f32 0.00022905065, %v374_v18 }
 0x108   : > { %v384_v20 = vadd.f32 2.3547966e-05, %v383_v19  ;;  %v376_v24 = vadd.f32 0.003408291, %v375_v21 }
 0x10a   : > { %v385_v22 = vmul.f32 %v384_v20, %v374_v18  ;;  %v377_v27 = vmul.f32 %v376_v24, %v374_v18 }
 0x10c   : > { %v386_v23 = vadd.f32 0.0010179626, %v385_v22  ;;  %v378_v30 = vadd.f32 0.050955694, %v377_v27 }
 0x10e   : > { %v387_v25 = vmul.f32 %v386_v23, %v374_v18  ;;  %v379_v33 = vmul.f32 %v378_v30, %v374_v18 }
 0x110   : > { %v388_v26 = vadd.f32 0.01407047, %v387_v25  ;;  %v380_v36 = vadd.f32 0.18520832, %v379_v33 }
 0x112   : > { %v389_v28 = vmul.f32 %v388_v26, %v374_v18  ;;  %v381_v37 = vmul.f32 %v380_v36, %v374_v18 }
 0x114   : > { %v390_v29 = vadd.f32 0.11098505, %v389_v28  ;;  %v382_v38 = vadd.f32 1.1283791, %v381_v37 }
 0x116   : > { %v391_v31 = vmul.f32 %v390_v29, %v374_v18  ;;  %v395_v40 = vmul.f32 %v598_v17, %v382_v38 }
 0x118   : > { %v392_v32 = vadd.f32 0.49746925, %v391_v31 }
 0x11a   : > { %v393_v34 = vmul.f32 %v392_v32, %v374_v18 }
 0x11c   : > { %v394_v35 = vadd.f32 1.0, %v393_v34 }
 0x11e   : > { %700 = vrcp.f32 %v394_v35 }
 0x12b   : > { %v701_v41 = vpop.eup %700 }
 0x12c   : > { %v397_v43 = vmul.f32 %v701_v41, %v395_v40 }
 0x12e   : > { %v398_v45 = vadd.f32 1.0, %v397_v43 }
 0x130   : > { %v399_v46 = vmul.f32 %v398_v45, %v370_v44 }
 0x132   : > { %v406_v47 = vsel %vm405_vm3, %v399_v46, 0.0 }
 0x133   : > { %416 = vadd.xlane.f32.xlu0 %v406_v47  ;;  %407 = vst [vmem:[%s260_s9] sm:$0xff] %v406_v47  ;;  %v422_v48 = vmul.f32 %v406_v47, %v406_v47 }
 0x135   : > { %423 = vadd.xlane.f32.xlu1 %v422_v48 }
 0x136   : > { %743 = shalt.err (!%p740_p7)
}
 0x137   : > { %s744_s21 = scalar_lea.hbm %s448_s27, 128  ;;  %s748_s13 = scalar_lea.hbm %s1031_s3, 256 }
 0x138   : > { %p745_p10 = scmp.ne.s32.totalorder %s448_s27, %s744_s21  ;;  %p749_p2 = scmp.lt.s32.totalorder %s448_s27, %s1031_s3 }
 0x139   : > { %p750_p8 = scmp.lt.s32.totalorder %s748_s13, %s744_s21 }
 0x13a   : > { %p746_p4 = pnand %p745_p10, %p900_p9 }
 0x13b   : > { %p751_p12 = por %p750_p8, %p749_p2 }
 0x13c   : > { %p747_p13 = pneg %p746_p4 }
 0x13e   : > { %p752_p0 = pnand %p751_p12, %p747_p13 }
 0x140   : > { %755 = shalt.err (!%p752_p0)
}
 0x141   : > { %634 = dma.vmem_to_hbm [thread:$0]  (%p900_p9), %s451_s16, 128, %s448_s27, %s428_s29   ;;  %v415_v49 = vld [vmem:[%s966_s10] sm:$0xff] }
 0x142   : > { %v421_v51 = vld [vmem:[%s977_s15] sm:$0xff] }
 0x1bc   : > { %v417_v50 = vpop.xlane.xlu0 %416 }
 0x1bd   : > { %v418_v52 = vadd.f32 %v417_v50, %v415_v49 }
 0x1be   : > { %v424_v53 = vpop.xlane.xlu1 %423 }
 0x1bf   : > { %420 = vst.msk [vmem:[%s966_s10] sm:$0xff] %vm412_vm2, %v418_v52  ;;  %v425_v54 = vadd.f32 %v424_v53, %v421_v51 }
 0x1c1   : > { %426 = vst.msk [vmem:[%s977_s15] sm:$0xff] %vm412_vm2, %v425_v54 }
 0x1c2 PF: > { %s468_s6 = sand.u32 1, %s790_s18   ;;  %p1039_p1 = scmp.ge.s32.totalorder %s810_s23, 2 }
 0x1c3   : > { %s469_s16 = scalar_lea.sflag [#allocation4], %s468_s6 }
 0x1c4   : > { %p641_p3 = pnand %p1039_p1, %p907_p11 }
 0x1c6   : > { %p642_p5 = pneg %p641_p3 }
 0x1c8   : > { %785 = dma.done.wait (%p642_p5), %s469_s16, 128  }
 0x1c9   : > { %787 = vsyncadd (%p642_p5), %s469_s16, 4294967168  ;;  %s22_s23 = sadd.s32 1, %s810_s23   ;;  %s1040_s18 = smov %s794_s19 }
 0x1ca   : > { %p19_p9 = scmp.ge.s32.totalorder %s22_s23, 4   ;;  %s1041_s19 = smov %s798_s20 }
 0x1cb   : > { %s1042_s20 = smov %s905_s7  ;;  %s1043_s21 = smov %s806_s22 }
 0x1cc   : > { %s1044_s22 = smov %s1046_s26  ;;  %21 = sbr.rel (!%p19_p9) target bundleno = 6 (0x6), region = 105 }
 0x1d1   :  { %488 = vsyncpa [#allocation3], 1 }
 0x1d2   :  { %490 = vsyncpa [#allocation3 + $0x1], 1 }
 0x1d3   :  { %491 = vsyncpa [#allocation4], 1 }
 0x1d4   :  { %493 = vsyncpa [#allocation4 + $0x1], 1 }

</bundles_post_ra>
